<compile_context>
chip_gen: v7x
topology: tpu7x:2x2x1
jax: 0.10.0
libtpu: 0.0.40
codegen_flags: <defaults>
</compile_context>

<pallas_src>
import math

import jax
import jax.numpy as jnp
import numpy as np
from jax.experimental import pallas as pl
from jax.experimental.pallas import tpu as pltpu

# ---- small, module-consistent config --------------------------------------
BATCH = 2
SEQ = 8
HIDDEN = 32
NUM_HEADS = 4
HEAD_DIM = HIDDEN // NUM_HEADS
INTER = 64
LN_EPS = 1e-12

# Column offsets inside the packed (1, N) bias / LayerNorm / mask slab.
_OFF_BQKV = 0
_OFF_BO = _OFF_BQKV + 3 * HIDDEN
_OFF_LN1G = _OFF_BO + HIDDEN
_OFF_LN1B = _OFF_LN1G + HIDDEN
_OFF_BI = _OFF_LN1B + HIDDEN
_OFF_BO2 = _OFF_BI + INTER
_OFF_LN2G = _OFF_BO2 + HIDDEN
_OFF_LN2B = _OFF_LN2G + HIDDEN
_OFF_MASK = _OFF_LN2B + HIDDEN
_SLAB_COLS = _OFF_MASK + BATCH * SEQ           # 368


def _layernorm(x, gamma, beta):
    # x: (R, H), gamma/beta: (1, H). Matches torch.nn.LayerNorm (biased var).
    mean = jnp.mean(x, axis=-1, keepdims=True)
    var = jnp.mean(jnp.square(x - mean), axis=-1, keepdims=True)
    inv = jax.lax.rsqrt(var + LN_EPS)
    return (x - mean) * inv * gamma + beta


def _gelu_exact(x):
    # torch.nn.GELU() default = exact erf formulation.
    return 0.5 * x * (1.0 + jax.lax.erf(x * (1.0 / np.sqrt(2.0))))


def bert_layer_kernel(x_ref, slab_ref, wcat_ref, wo2_ref, out_ref):
    B, S, H, NH, HD, I = BATCH, SEQ, HIDDEN, NUM_HEADS, HEAD_DIM, INTER

    x = x_ref[...]                                                   # (B*S, H)

    # ---- packed parameter views (static slices of the two weight slabs) ----
    w_qkv = wcat_ref[:, 0:3 * H]                                     # (H, 3H)
    w_o = wcat_ref[:, 3 * H:4 * H]                                   # (H, H)
    w_i = wcat_ref[:, 4 * H:4 * H + I]                               # (H, I)

    b_qkv = slab_ref[:, _OFF_BQKV:_OFF_BQKV + 3 * H]                 # (1, 3H)
    b_o = slab_ref[:, _OFF_BO:_OFF_BO + H]
    ln1_g = slab_ref[:, _OFF_LN1G:_OFF_LN1G + H]
    ln1_b = slab_ref[:, _OFF_LN1B:_OFF_LN1B + H]
    b_i = slab_ref[:, _OFF_BI:_OFF_BI + I]
    b_o2 = slab_ref[:, _OFF_BO2:_OFF_BO2 + H]
    ln2_g = slab_ref[:, _OFF_LN2G:_OFF_LN2G + H]
    ln2_b = slab_ref[:, _OFF_LN2B:_OFF_LN2B + H]
    mrow = slab_ref[:, _OFF_MASK:_OFF_MASK + B * S]                  # (1, B*S)

    # ---- fused QKV projection: one MXU call, one bias add ------------------
    qkv = jnp.dot(x, w_qkv, preferred_element_type=jnp.float32) + b_qkv   # (B*S, 3H)
    # Split only the second-minor dim at the sublane-tile boundary (lane dim
    # unchanged): (B*S, 3H) -> (B, S, 3H).  No lane relayout.
    qkv3 = qkv.reshape(B, S, 3 * H)

    # Additive attention-mask bias, built in-kernel: (B, 1, S).
    mask3 = jnp.concatenate(
        [mrow[:, b * S:(b + 1) * S][None] for b in range(B)], axis=0)     # (B,1,S)
    bias3 = (1.0 - mask3) * -10000.0

    scale = 1.0 / math.sqrt(HD)
    prob_heads = []            # NH arrays of shape (B, S, S)
    attn = None                # accumulates the SelfOutput dense, (B*S, H)
    for h in range(NH):
        # Head views: cheap in-register lane slices ([all-Q|all-K|all-V] layout).
        qh = qkv3[:, :, h * HD:(h + 1) * HD]                          # (B,S,HD)
        kh = qkv3[:, :, H + h * HD:H + (h + 1) * HD]
        vh = qkv3[:, :, 2 * H + h * HD:2 * H + (h + 1) * HD]

        s = jnp.einsum("bqd,bkd->bqk", qh, kh,
                       preferred_element_type=jnp.float32)            # (B,S,S)
        s = s * scale + bias3
        s = s - jnp.max(s, axis=-1, keepdims=True)                    # stable softmax
        e = jnp.exp(s)
        p = e * pl.reciprocal(jnp.sum(e, axis=-1, keepdims=True), approx=False)
        prob_heads.append(p)                                          # dropout = identity

        ctx_h = jnp.einsum("bqk,bkd->bqd", p, vh,
                           preferred_element_type=jnp.float32)        # (B,S,HD)
        # Fold the head straight into the SelfOutput dense: ctx @ w_o ==
        # sum_h ctx_h @ w_o[h*HD:(h+1)*HD, :].  Avoids re-packing the context.
        part = jnp.dot(ctx_h.reshape(B * S, HD),                      # tile-aligned merge
                       w_o[h * HD:(h + 1) * HD, :],                   # sublane-aligned slice
                       preferred_element_type=jnp.float32)            # (B*S, H)
        attn = part if attn is None else attn + part

    attn = attn + b_o

    # ---- SelfOutput: dense + residual + LayerNorm (dropout = identity) -----
    h1 = _layernorm(attn + x, ln1_g, ln1_b)

    # ---- Intermediate: dense + exact GELU -----------------------------------
    inter = _gelu_exact(
        jnp.dot(h1, w_i, preferred_element_type=jnp.float32) + b_i)

    # ---- Output: dense + residual + LayerNorm (dropout = identity) ---------
    o = jnp.dot(inter, wo2_ref[...], preferred_element_type=jnp.float32) + b_o2
    out2d = _layernorm(o + h1, ln2_g, ln2_b)                          # (B*S, H)

    # ---- single lane-dense (8, 128) store: [ out(b0) | out(b1) | probs ] ----
    # Rows = seq position; columns: [0, B*H) hold the layer output per batch,
    # [B*H, B*H + B*NH*S) hold the attention probs, ordered (b, h, k).
    pieces = [out2d[b * S:(b + 1) * S, :] for b in range(B)]          # B x (S, H)
    for b in range(B):
        for h in range(NH):
            pieces.append(prob_heads[h][b])                           # (S, S)
    out_ref[...] = jnp.concatenate(pieces, axis=-1)                   # (S, 128) = 1 vreg


def bert_layer(x, mask, params):
    B, S, H = x.shape
    NH = NUM_HEADS

    # Wrapper-side layout plumbing (trivial sizes, pure XLA).
    x2d = x.reshape(B * S, H)

    # Fused QKV weights grouped [all-Q | all-K | all-V] (32-lane aligned blocks).
    w_qkv = jnp.concatenate([params["wq"], params["wk"], params["wv"]], axis=1)
    b_qkv = jnp.concatenate([params["bq"], params["bk"], params["bv"]], axis=1)

    # Packed weight slab (all matrices with H input rows) + separate wo2.
    wcat = jnp.concatenate([w_qkv, params["wo"], params["wi"]], axis=1)     # (H, 192)
    # Packed (1, N) bias / LayerNorm / raw-mask slab -> one small input DMA.
    slab = jnp.concatenate(
        [b_qkv, params["bo"], params["ln1_g"], params["ln1_b"],
         params["bi"], params["bo2"], params["ln2_g"], params["ln2_b"],
         mask.reshape(1, B * S).astype(jnp.float32)], axis=1)               # (1, 368)
    assert slab.shape[1] == _SLAB_COLS

    fused_cols = B * H + B * NH * S                                         # 128

    full = lambda a: pl.BlockSpec(a.shape, lambda i: (0,) * a.ndim)

    grid_spec = pltpu.PrefetchScalarGridSpec(
        num_scalar_prefetch=0,
        grid=(1,),                                  # whole problem = one grid step
        in_specs=[full(x2d), full(slab), full(wcat), full(params["wo2"])],
        out_specs=pl.BlockSpec((S, fused_cols), lambda i: (0, 0)),
    )
    fused = pl.pallas_call(
        bert_layer_kernel,
        out_shape=jax.ShapeDtypeStruct((S, fused_cols), jnp.float32),
        grid_spec=grid_spec,
        compiler_params=pltpu.CompilerParams(
            dimension_semantics=("arbitrary",)),
    )(x2d, slab, wcat, params["wo2"])

    # Unpack the fused (8, 128) slab outside the kernel.
    out2d = jnp.concatenate([fused[:, b * H:(b + 1) * H] for b in range(B)], axis=0)
    out = out2d.reshape(B, S, H)
    prob = fused[:, B * H:].reshape(S, B, NH, S).transpose(1, 2, 0, 3)      # (B,NH,S,S)
    return out, prob


# -------------------- pure-JAX reference (for sanity) ----------------------
def ref_forward(x, mask, p):
    B, S, H = x.shape
    q = (x @ p["wq"] + p["bq"]).reshape(B, S, NUM_HEADS, HEAD_DIM).transpose(0, 2, 1, 3)
    k = (x @ p["wk"] + p["bk"]).reshape(B, S, NUM_HEADS, HEAD_DIM).transpose(0, 2, 1, 3)
    v = (x @ p["wv"] + p["bv"]).reshape(B, S, NUM_HEADS, HEAD_DIM).transpose(0, 2, 1, 3)
    s = jnp.einsum("bhqd,bhkd->bhqk", q, k) / math.sqrt(HEAD_DIM)
    s = s + (1.0 - mask)[:, None, None, :] * -10000.0
    prob = jax.nn.softmax(s, axis=-1)
    ctx = jnp.einsum("bhqk,bhkd->bhqd", prob, v).transpose(0, 2, 1, 3).reshape(B, S, H)

    def ln(y, g, b):
        m = jnp.mean(y, -1, keepdims=True)
        var = jnp.mean((y - m) ** 2, -1, keepdims=True)
        return (y - m) * jax.lax.rsqrt(var + LN_EPS) * g + b

    h1 = ln(ctx @ p["wo"] + p["bo"] + x, p["ln1_g"], p["ln1_b"])
    inter = jax.nn.gelu(h1 @ p["wi"] + p["bi"], approximate=False)
    out = ln(inter @ p["wo2"] + p["bo2"] + h1, p["ln2_g"], p["ln2_b"])
    return out, prob


def init_params(key):
    ks = jax.random.split(key, 8)
    n = lambda k, shape: (jax.random.normal(k, shape, jnp.float32) * 0.02)
    return {
        # Linear weights stored as [in, out] (torch Linear weight transposed)
        "wq": n(ks[0], (HIDDEN, HIDDEN)), "bq": jnp.zeros((1, HIDDEN), jnp.float32),
        "wk": n(ks[1], (HIDDEN, HIDDEN)), "bk": jnp.zeros((1, HIDDEN), jnp.float32),
        "wv": n(ks[2], (HIDDEN, HIDDEN)), "bv": jnp.zeros((1, HIDDEN), jnp.float32),
        "wo": n(ks[3], (HIDDEN, HIDDEN)), "bo": jnp.zeros((1, HIDDEN), jnp.float32),
        "ln1_g": jnp.ones((1, HIDDEN), jnp.float32),
        "ln1_b": jnp.zeros((1, HIDDEN), jnp.float32),
        "wi": n(ks[4], (HIDDEN, INTER)), "bi": jnp.zeros((1, INTER), jnp.float32),
        "wo2": n(ks[5], (INTER, HIDDEN)), "bo2": jnp.zeros((1, HIDDEN), jnp.float32),
        "ln2_g": jnp.ones((1, HIDDEN), jnp.float32),
        "ln2_b": jnp.zeros((1, HIDDEN), jnp.float32),
    }


if __name__ == "__main__":
    key = jax.random.PRNGKey(0)
    k_x, k_p = jax.random.split(key)
    x = jax.random.normal(k_x, (BATCH, SEQ, HIDDEN), jnp.float32)
    # mask: last 2 positions of batch 1 masked out
    mask = jnp.ones((BATCH, SEQ), jnp.float32).at[1, -2:].set(0.0)
    params = init_params(k_p)

    out, prob = bert_layer(x, mask, params)
    out, prob = jax.block_until_ready((out, prob))

    ref_out, ref_prob = ref_forward(x, mask, params)
    assert np.allclose(out, ref_out, atol=1e-4, rtol=1e-4), "output mismatch"
    assert np.allclose(prob, ref_prob, atol=1e-5, rtol=1e-5), "prob mismatch"
    print("KERNEL_OK")
</pallas_src>

<mosaic_0001>
module attributes {stable_mosaic.version = 11 : i64} {
  func.func @bert_layer_kernel(%arg0: i32, %arg1: memref<16x32xf32, #tpu.memory_space<vmem>>, %arg2: memref<1x368xf32, #tpu.memory_space<vmem>>, %arg3: memref<32x192xf32, #tpu.memory_space<vmem>>, %arg4: memref<64x32xf32, #tpu.memory_space<vmem>>, %arg5: memref<8x128xf32, #tpu.memory_space<vmem>>) attributes {dimension_semantics = [#tpu.dimension_semantics<arbitrary>], iteration_bounds = array<i64: 1>, scalar_prefetch = 0 : i64, scratch_operands = 0 : i64, tpu.core_type = #tpu.core_type<tc>, window_params = [{pipeline_mode = #tpu.pipeline_mode<synchronous>, transform_indices = @transform_0, window_bounds = array<i64: 16, 32>}, {pipeline_mode = #tpu.pipeline_mode<synchronous>, transform_indices = @transform_1, window_bounds = array<i64: 1, 368>}, {pipeline_mode = #tpu.pipeline_mode<synchronous>, transform_indices = @transform_2, window_bounds = array<i64: 32, 192>}, {pipeline_mode = #tpu.pipeline_mode<synchronous>, transform_indices = @transform_3, window_bounds = array<i64: 64, 32>}, {pipeline_mode = #tpu.pipeline_mode<synchronous>, transform_indices = @transform_4, window_bounds = array<i64: 8, 128>}]} {
    %c0 = arith.constant 0 : index
    %c0_0 = arith.constant 0 : index
    %0 = vector.load %arg1[%c0, %c0_0] : memref<16x32xf32, #tpu.memory_space<vmem>>, vector<16x32xf32>
    %c0_1 = arith.constant 0 : index
    %c0_2 = arith.constant 0 : index
    %1 = vector.load %arg3[%c0_1, %c0_2] : memref<32x192xf32, #tpu.memory_space<vmem>>, vector<32x96xf32>
    %c0_3 = arith.constant 0 : index
    %c96 = arith.constant 96 : index
    %2 = vector.load %arg3[%c0_3, %c96] : memref<32x192xf32, #tpu.memory_space<vmem>>, vector<32x32xf32>
    %c0_4 = arith.constant 0 : index
    %c128 = arith.constant 128 : index
    %3 = vector.load %arg3[%c0_4, %c128] : memref<32x192xf32, #tpu.memory_space<vmem>>, vector<32x64xf32>
    %c0_5 = arith.constant 0 : index
    %c0_6 = arith.constant 0 : index
    %4 = vector.load %arg2[%c0_5, %c0_6] : memref<1x368xf32, #tpu.memory_space<vmem>>, vector<1x96xf32>
    %c0_7 = arith.constant 0 : index
    %c96_8 = arith.constant 96 : index
    %5 = vector.load %arg2[%c0_7, %c96_8] : memref<1x368xf32, #tpu.memory_space<vmem>>, vector<1x32xf32>
    %c0_9 = arith.constant 0 : index
    %c128_10 = arith.constant 128 : index
    %6 = vector.load %arg2[%c0_9, %c128_10] : memref<1x368xf32, #tpu.memory_space<vmem>>, vector<1x32xf32>
    %c0_11 = arith.constant 0 : index
    %c160 = arith.constant 160 : index
    %7 = vector.load %arg2[%c0_11, %c160] : memref<1x368xf32, #tpu.memory_space<vmem>>, vector<1x32xf32>
    %c0_12 = arith.constant 0 : index
    %c192 = arith.constant 192 : index
    %8 = vector.load %arg2[%c0_12, %c192] : memref<1x368xf32, #tpu.memory_space<vmem>>, vector<1x64xf32>
    %c0_13 = arith.constant 0 : index
    %c256 = arith.constant 256 : index
    %9 = vector.load %arg2[%c0_13, %c256] : memref<1x368xf32, #tpu.memory_space<vmem>>, vector<1x32xf32>
    %c0_14 = arith.constant 0 : index
    %c288 = arith.constant 288 : index
    %10 = vector.load %arg2[%c0_14, %c288] : memref<1x368xf32, #tpu.memory_space<vmem>>, vector<1x32xf32>
    %c0_15 = arith.constant 0 : index
    %c320 = arith.constant 320 : index
    %11 = vector.load %arg2[%c0_15, %c320] : memref<1x368xf32, #tpu.memory_space<vmem>>, vector<1x32xf32>
    %c0_16 = arith.constant 0 : index
    %c352 = arith.constant 352 : index
    %12 = vector.load %arg2[%c0_16, %c352] : memref<1x368xf32, #tpu.memory_space<vmem>>, vector<1x16xf32>
    %cst = arith.constant dense<0.000000e+00> : vector<16x96xf32>
    %13 = tpu.matmul %0, %1, %cst {dimension_numbers = #tpu.dot_dimension_numbers<[1], [0], [0], [1], [0, 0, 1, 1], [], []>} : vector<16x32xf32>, vector<32x96xf32>, vector<16x96xf32> -> vector<16x96xf32>
    %14 = vector.broadcast %4 : vector<1x96xf32> to vector<16x96xf32>
    %15 = arith.addf %13, %14 : vector<16x96xf32>
    %16 = vector.shape_cast %15 : vector<16x96xf32> to vector<2x8x96xf32>
    %17 = vector.extract_strided_slice %12 {offsets = [0, 0], sizes = [1, 8], strides = [1, 1]} : vector<1x16xf32> to vector<1x8xf32>
    %18 = vector.shape_cast %17 : vector<1x8xf32> to vector<1x1x8xf32>
    %19 = vector.extract_strided_slice %12 {offsets = [0, 8], sizes = [1, 8], strides = [1, 1]} : vector<1x16xf32> to vector<1x8xf32>
    %20 = vector.shape_cast %19 : vector<1x8xf32> to vector<1x1x8xf32>
    %21 = tpu.concatenate %18, %20 in 0 : vector<1x1x8xf32>, vector<1x1x8xf32> -> vector<2x1x8xf32>
    %cst_17 = arith.constant 1.000000e+00 : f32
    %22 = vector.broadcast %cst_17 : f32 to vector<2x1x8xf32>
    %23 = arith.subf %22, %21 : vector<2x1x8xf32>
    %cst_18 = arith.constant -1.000000e+04 : f32
    %24 = vector.broadcast %cst_18 : f32 to vector<2x1x8xf32>
    %25 = arith.mulf %23, %24 : vector<2x1x8xf32>
    %26 = vector.extract_strided_slice %16 {offsets = [0, 0, 0], sizes = [2, 8, 8], strides = [1, 1, 1]} : vector<2x8x96xf32> to vector<2x8x8xf32>
    %27 = vector.extract_strided_slice %16 {offsets = [0, 0, 32], sizes = [2, 8, 8], strides = [1, 1, 1]} : vector<2x8x96xf32> to vector<2x8x8xf32>
    %28 = vector.extract_strided_slice %16 {offsets = [0, 0, 64], sizes = [2, 8, 8], strides = [1, 1, 1]} : vector<2x8x96xf32> to vector<2x8x8xf32>
    "tpu.trace_start"() <{level = 10 : i32, message = "bqd,bkd->bqk"}> : () -> ()
    %cst_19 = arith.constant dense<0.000000e+00> : vector<2x8x8xf32>
    %29 = tpu.matmul %26, %27, %cst_19 {dimension_numbers = #tpu.dot_dimension_numbers<[2], [2], [1], [1], [0, 0, 0, 1, 1, 1], [0], [0]>} : vector<2x8x8xf32>, vector<2x8x8xf32>, vector<2x8x8xf32> -> vector<2x8x8xf32>
    "tpu.trace_stop"() : () -> ()
    %cst_20 = arith.constant 0.353553385 : f32
    %30 = vector.broadcast %cst_20 : f32 to vector<2x8x8xf32>
    %31 = arith.mulf %29, %30 : vector<2x8x8xf32>
    %32 = vector.broadcast %25 : vector<2x1x8xf32> to vector<2x8x8xf32>
    %33 = arith.addf %31, %32 : vector<2x8x8xf32>
    %cst_21 = arith.constant dense<0xFF800000> : vector<2x8xf32>
    %34 = vector.multi_reduction <maximumf>, %33, %cst_21 [2] : vector<2x8x8xf32> to vector<2x8xf32>
    %35 = vector.shape_cast %34 : vector<2x8xf32> to vector<2x8x1xf32>
    %36 = vector.broadcast %35 : vector<2x8x1xf32> to vector<2x8x8xf32>
    %37 = arith.subf %33, %36 : vector<2x8x8xf32>
    %38 = math.exp %37 : vector<2x8x8xf32>
    %cst_22 = arith.constant dense<0.000000e+00> : vector<2x8xf32>
    %39 = vector.multi_reduction <add>, %38, %cst_22 [2] : vector<2x8x8xf32> to vector<2x8xf32>
    %40 = vector.shape_cast %39 : vector<2x8xf32> to vector<2x8x1xf32>
    %41 = tpu.reciprocal %40 : vector<2x8x1xf32> -> vector<2x8x1xf32>
    %42 = vector.broadcast %41 : vector<2x8x1xf32> to vector<2x8x8xf32>
    %43 = arith.mulf %38, %42 : vector<2x8x8xf32>
    "tpu.trace_start"() <{level = 10 : i32, message = "bqk,bkd->bqd"}> : () -> ()
    %cst_23 = arith.constant dense<0.000000e+00> : vector<2x8x8xf32>
    %44 = tpu.matmul %43, %28, %cst_23 {dimension_numbers = #tpu.dot_dimension_numbers<[2], [1], [1], [2], [0, 0, 0, 1, 1, 2], [0], [0]>} : vector<2x8x8xf32>, vector<2x8x8xf32>, vector<2x8x8xf32> -> vector<2x8x8xf32>
    "tpu.trace_stop"() : () -> ()
    %45 = vector.shape_cast %44 : vector<2x8x8xf32> to vector<16x8xf32>
    %46 = vector.extract_strided_slice %2 {offsets = [0, 0], sizes = [8, 32], strides = [1, 1]} : vector<32x32xf32> to vector<8x32xf32>
    %cst_24 = arith.constant dense<0.000000e+00> : vector<16x32xf32>
    %47 = tpu.matmul %45, %46, %cst_24 {dimension_numbers = #tpu.dot_dimension_numbers<[1], [0], [0], [1], [0, 0, 1, 1], [], []>} : vector<16x8xf32>, vector<8x32xf32>, vector<16x32xf32> -> vector<16x32xf32>
    %48 = vector.extract_strided_slice %16 {offsets = [0, 0, 8], sizes = [2, 8, 8], strides = [1, 1, 1]} : vector<2x8x96xf32> to vector<2x8x8xf32>
    %49 = vector.extract_strided_slice %16 {offsets = [0, 0, 40], sizes = [2, 8, 8], strides = [1, 1, 1]} : vector<2x8x96xf32> to vector<2x8x8xf32>
    %50 = vector.extract_strided_slice %16 {offsets = [0, 0, 72], sizes = [2, 8, 8], strides = [1, 1, 1]} : vector<2x8x96xf32> to vector<2x8x8xf32>
    "tpu.trace_start"() <{level = 10 : i32, message = "bqd,bkd->bqk"}> : () -> ()
    %cst_25 = arith.constant dense<0.000000e+00> : vector<2x8x8xf32>
    %51 = tpu.matmul %48, %49, %cst_25 {dimension_numbers = #tpu.dot_dimension_numbers<[2], [2], [1], [1], [0, 0, 0, 1, 1, 1], [0], [0]>} : vector<2x8x8xf32>, vector<2x8x8xf32>, vector<2x8x8xf32> -> vector<2x8x8xf32>
    "tpu.trace_stop"() : () -> ()
    %cst_26 = arith.constant 0.353553385 : f32
    %52 = vector.broadcast %cst_26 : f32 to vector<2x8x8xf32>
    %53 = arith.mulf %51, %52 : vector<2x8x8xf32>
    %54 = vector.broadcast %25 : vector<2x1x8xf32> to vector<2x8x8xf32>
    %55 = arith.addf %53, %54 : vector<2x8x8xf32>
    %cst_27 = arith.constant dense<0xFF800000> : vector<2x8xf32>
    %56 = vector.multi_reduction <maximumf>, %55, %cst_27 [2] : vector<2x8x8xf32> to vector<2x8xf32>
    %57 = vector.shape_cast %56 : vector<2x8xf32> to vector<2x8x1xf32>
    %58 = vector.broadcast %57 : vector<2x8x1xf32> to vector<2x8x8xf32>
    %59 = arith.subf %55, %58 : vector<2x8x8xf32>
    %60 = math.exp %59 : vector<2x8x8xf32>
    %cst_28 = arith.constant dense<0.000000e+00> : vector<2x8xf32>
    %61 = vector.multi_reduction <add>, %60, %cst_28 [2] : vector<2x8x8xf32> to vector<2x8xf32>
    %62 = vector.shape_cast %61 : vector<2x8xf32> to vector<2x8x1xf32>
    %63 = tpu.reciprocal %62 : vector<2x8x1xf32> -> vector<2x8x1xf32>
    %64 = vector.broadcast %63 : vector<2x8x1xf32> to vector<2x8x8xf32>
    %65 = arith.mulf %60, %64 : vector<2x8x8xf32>
    "tpu.trace_start"() <{level = 10 : i32, message = "bqk,bkd->bqd"}> : () -> ()
    %cst_29 = arith.constant dense<0.000000e+00> : vector<2x8x8xf32>
    %66 = tpu.matmul %65, %50, %cst_29 {dimension_numbers = #tpu.dot_dimension_numbers<[2], [1], [1], [2], [0, 0, 0, 1, 1, 2], [0], [0]>} : vector<2x8x8xf32>, vector<2x8x8xf32>, vector<2x8x8xf32> -> vector<2x8x8xf32>
    "tpu.trace_stop"() : () -> ()
    %67 = vector.shape_cast %66 : vector<2x8x8xf32> to vector<16x8xf32>
    %68 = vector.extract_strided_slice %2 {offsets = [8, 0], sizes = [8, 32], strides = [1, 1]} : vector<32x32xf32> to vector<8x32xf32>
    %cst_30 = arith.constant dense<0.000000e+00> : vector<16x32xf32>
    %69 = tpu.matmul %67, %68, %cst_30 {dimension_numbers = #tpu.dot_dimension_numbers<[1], [0], [0], [1], [0, 0, 1, 1], [], []>} : vector<16x8xf32>, vector<8x32xf32>, vector<16x32xf32> -> vector<16x32xf32>
    %70 = arith.addf %47, %69 : vector<16x32xf32>
    %71 = vector.extract_strided_slice %16 {offsets = [0, 0, 16], sizes = [2, 8, 8], strides = [1, 1, 1]} : vector<2x8x96xf32> to vector<2x8x8xf32>
    %72 = vector.extract_strided_slice %16 {offsets = [0, 0, 48], sizes = [2, 8, 8], strides = [1, 1, 1]} : vector<2x8x96xf32> to vector<2x8x8xf32>
    %73 = vector.extract_strided_slice %16 {offsets = [0, 0, 80], sizes = [2, 8, 8], strides = [1, 1, 1]} : vector<2x8x96xf32> to vector<2x8x8xf32>
    "tpu.trace_start"() <{level = 10 : i32, message = "bqd,bkd->bqk"}> : () -> ()
    %cst_31 = arith.constant dense<0.000000e+00> : vector<2x8x8xf32>
    %74 = tpu.matmul %71, %72, %cst_31 {dimension_numbers = #tpu.dot_dimension_numbers<[2], [2], [1], [1], [0, 0, 0, 1, 1, 1], [0], [0]>} : vector<2x8x8xf32>, vector<2x8x8xf32>, vector<2x8x8xf32> -> vector<2x8x8xf32>
    "tpu.trace_stop"() : () -> ()
    %cst_32 = arith.constant 0.353553385 : f32
    %75 = vector.broadcast %cst_32 : f32 to vector<2x8x8xf32>
    %76 = arith.mulf %74, %75 : vector<2x8x8xf32>
    %77 = vector.broadcast %25 : vector<2x1x8xf32> to vector<2x8x8xf32>
    %78 = arith.addf %76, %77 : vector<2x8x8xf32>
    %cst_33 = arith.constant dense<0xFF800000> : vector<2x8xf32>
    %79 = vector.multi_reduction <maximumf>, %78, %cst_33 [2] : vector<2x8x8xf32> to vector<2x8xf32>
    %80 = vector.shape_cast %79 : vector<2x8xf32> to vector<2x8x1xf32>
    %81 = vector.broadcast %80 : vector<2x8x1xf32> to vector<2x8x8xf32>
    %82 = arith.subf %78, %81 : vector<2x8x8xf32>
    %83 = math.exp %82 : vector<2x8x8xf32>
    %cst_34 = arith.constant dense<0.000000e+00> : vector<2x8xf32>
    %84 = vector.multi_reduction <add>, %83, %cst_34 [2] : vector<2x8x8xf32> to vector<2x8xf32>
    %85 = vector.shape_cast %84 : vector<2x8xf32> to vector<2x8x1xf32>
    %86 = tpu.reciprocal %85 : vector<2x8x1xf32> -> vector<2x8x1xf32>
    %87 = vector.broadcast %86 : vector<2x8x1xf32> to vector<2x8x8xf32>
    %88 = arith.mulf %83, %87 : vector<2x8x8xf32>
    "tpu.trace_start"() <{level = 10 : i32, message = "bqk,bkd->bqd"}> : () -> ()
    %cst_35 = arith.constant dense<0.000000e+00> : vector<2x8x8xf32>
    %89 = tpu.matmul %88, %73, %cst_35 {dimension_numbers = #tpu.dot_dimension_numbers<[2], [1], [1], [2], [0, 0, 0, 1, 1, 2], [0], [0]>} : vector<2x8x8xf32>, vector<2x8x8xf32>, vector<2x8x8xf32> -> vector<2x8x8xf32>
    "tpu.trace_stop"() : () -> ()
    %90 = vector.shape_cast %89 : vector<2x8x8xf32> to vector<16x8xf32>
    %91 = vector.extract_strided_slice %2 {offsets = [16, 0], sizes = [8, 32], strides = [1, 1]} : vector<32x32xf32> to vector<8x32xf32>
    %cst_36 = arith.constant dense<0.000000e+00> : vector<16x32xf32>
    %92 = tpu.matmul %90, %91, %cst_36 {dimension_numbers = #tpu.dot_dimension_numbers<[1], [0], [0], [1], [0, 0, 1, 1], [], []>} : vector<16x8xf32>, vector<8x32xf32>, vector<16x32xf32> -> vector<16x32xf32>
    %93 = arith.addf %70, %92 : vector<16x32xf32>
    %94 = vector.extract_strided_slice %16 {offsets = [0, 0, 24], sizes = [2, 8, 8], strides = [1, 1, 1]} : vector<2x8x96xf32> to vector<2x8x8xf32>
    %95 = vector.extract_strided_slice %16 {offsets = [0, 0, 56], sizes = [2, 8, 8], strides = [1, 1, 1]} : vector<2x8x96xf32> to vector<2x8x8xf32>
    %96 = vector.extract_strided_slice %16 {offsets = [0, 0, 88], sizes = [2, 8, 8], strides = [1, 1, 1]} : vector<2x8x96xf32> to vector<2x8x8xf32>
    "tpu.trace_start"() <{level = 10 : i32, message = "bqd,bkd->bqk"}> : () -> ()
    %cst_37 = arith.constant dense<0.000000e+00> : vector<2x8x8xf32>
    %97 = tpu.matmul %94, %95, %cst_37 {dimension_numbers = #tpu.dot_dimension_numbers<[2], [2], [1], [1], [0, 0, 0, 1, 1, 1], [0], [0]>} : vector<2x8x8xf32>, vector<2x8x8xf32>, vector<2x8x8xf32> -> vector<2x8x8xf32>
    "tpu.trace_stop"() : () -> ()
    %cst_38 = arith.constant 0.353553385 : f32
    %98 = vector.broadcast %cst_38 : f32 to vector<2x8x8xf32>
    %99 = arith.mulf %97, %98 : vector<2x8x8xf32>
    %100 = vector.broadcast %25 : vector<2x1x8xf32> to vector<2x8x8xf32>
    %101 = arith.addf %99, %100 : vector<2x8x8xf32>
    %cst_39 = arith.constant dense<0xFF800000> : vector<2x8xf32>
    %102 = vector.multi_reduction <maximumf>, %101, %cst_39 [2] : vector<2x8x8xf32> to vector<2x8xf32>
    %103 = vector.shape_cast %102 : vector<2x8xf32> to vector<2x8x1xf32>
    %104 = vector.broadcast %103 : vector<2x8x1xf32> to vector<2x8x8xf32>
    %105 = arith.subf %101, %104 : vector<2x8x8xf32>
    %106 = math.exp %105 : vector<2x8x8xf32>
    %cst_40 = arith.constant dense<0.000000e+00> : vector<2x8xf32>
    %107 = vector.multi_reduction <add>, %106, %cst_40 [2] : vector<2x8x8xf32> to vector<2x8xf32>
    %108 = vector.shape_cast %107 : vector<2x8xf32> to vector<2x8x1xf32>
    %109 = tpu.reciprocal %108 : vector<2x8x1xf32> -> vector<2x8x1xf32>
    %110 = vector.broadcast %109 : vector<2x8x1xf32> to vector<2x8x8xf32>
    %111 = arith.mulf %106, %110 : vector<2x8x8xf32>
    "tpu.trace_start"() <{level = 10 : i32, message = "bqk,bkd->bqd"}> : () -> ()
    %cst_41 = arith.constant dense<0.000000e+00> : vector<2x8x8xf32>
    %112 = tpu.matmul %111, %96, %cst_41 {dimension_numbers = #tpu.dot_dimension_numbers<[2], [1], [1], [2], [0, 0, 0, 1, 1, 2], [0], [0]>} : vector<2x8x8xf32>, vector<2x8x8xf32>, vector<2x8x8xf32> -> vector<2x8x8xf32>
    "tpu.trace_stop"() : () -> ()
    %113 = vector.shape_cast %112 : vector<2x8x8xf32> to vector<16x8xf32>
    %114 = vector.extract_strided_slice %2 {offsets = [24, 0], sizes = [8, 32], strides = [1, 1]} : vector<32x32xf32> to vector<8x32xf32>
    %cst_42 = arith.constant dense<0.000000e+00> : vector<16x32xf32>
    %115 = tpu.matmul %113, %114, %cst_42 {dimension_numbers = #tpu.dot_dimension_numbers<[1], [0], [0], [1], [0, 0, 1, 1], [], []>} : vector<16x8xf32>, vector<8x32xf32>, vector<16x32xf32> -> vector<16x32xf32>
    %116 = arith.addf %93, %115 : vector<16x32xf32>
    %117 = vector.broadcast %5 : vector<1x32xf32> to vector<16x32xf32>
    %118 = arith.addf %116, %117 : vector<16x32xf32>
    %119 = arith.addf %118, %0 : vector<16x32xf32>
    %cst_43 = arith.constant dense<0.000000e+00> : vector<16xf32>
    %120 = vector.multi_reduction <add>, %119, %cst_43 [1] : vector<16x32xf32> to vector<16xf32>
    %121 = vector.shape_cast %120 : vector<16xf32> to vector<16x1xf32>
    %cst_44 = arith.constant 3.200000e+01 : f32
    %122 = vector.broadcast %cst_44 : f32 to vector<16x1xf32>
    %123 = arith.divf %121, %122 : vector<16x1xf32>
    %124 = vector.broadcast %123 : vector<16x1xf32> to vector<16x32xf32>
    %125 = arith.subf %119, %124 : vector<16x32xf32>
    %126 = arith.mulf %125, %125 : vector<16x32xf32>
    %cst_45 = arith.constant dense<0.000000e+00> : vector<16xf32>
    %127 = vector.multi_reduction <add>, %126, %cst_45 [1] : vector<16x32xf32> to vector<16xf32>
    %128 = vector.shape_cast %127 : vector<16xf32> to vector<16x1xf32>
    %cst_46 = arith.constant 3.200000e+01 : f32
    %129 = vector.broadcast %cst_46 : f32 to vector<16x1xf32>
    %130 = arith.divf %128, %129 : vector<16x1xf32>
    %cst_47 = arith.constant 9.99999996E-13 : f32
    %131 = vector.broadcast %cst_47 : f32 to vector<16x1xf32>
    %132 = arith.addf %130, %131 : vector<16x1xf32>
    %133 = math.rsqrt %132 : vector<16x1xf32>
    %134 = vector.broadcast %123 : vector<16x1xf32> to vector<16x32xf32>
    %135 = arith.subf %119, %134 : vector<16x32xf32>
    %136 = vector.broadcast %133 : vector<16x1xf32> to vector<16x32xf32>
    %137 = arith.mulf %135, %136 : vector<16x32xf32>
    %138 = vector.broadcast %6 : vector<1x32xf32> to vector<16x32xf32>
    %139 = arith.mulf %137, %138 : vector<16x32xf32>
    %140 = vector.broadcast %7 : vector<1x32xf32> to vector<16x32xf32>
    %141 = arith.addf %139, %140 : vector<16x32xf32>
    %cst_48 = arith.constant dense<0.000000e+00> : vector<16x64xf32>
    %142 = tpu.matmul %141, %3, %cst_48 {dimension_numbers = #tpu.dot_dimension_numbers<[1], [0], [0], [1], [0, 0, 1, 1], [], []>} : vector<16x32xf32>, vector<32x64xf32>, vector<16x64xf32> -> vector<16x64xf32>
    %143 = vector.broadcast %8 : vector<1x64xf32> to vector<16x64xf32>
    %144 = arith.addf %142, %143 : vector<16x64xf32>
    %cst_49 = arith.constant 5.000000e-01 : f32
    %145 = vector.broadcast %cst_49 : f32 to vector<16x64xf32>
    %146 = arith.mulf %145, %144 : vector<16x64xf32>
    %cst_50 = arith.constant 0.707106769 : f32
    %147 = vector.broadcast %cst_50 : f32 to vector<16x64xf32>
    %148 = arith.mulf %144, %147 : vector<16x64xf32>
    %149 = math.erf %148 : vector<16x64xf32>
    %cst_51 = arith.constant 1.000000e+00 : f32
    %150 = vector.broadcast %cst_51 : f32 to vector<16x64xf32>
    %151 = arith.addf %150, %149 : vector<16x64xf32>
    %152 = arith.mulf %146, %151 : vector<16x64xf32>
    %c0_52 = arith.constant 0 : index
    %c0_53 = arith.constant 0 : index
    %153 = vector.load %arg4[%c0_52, %c0_53] : memref<64x32xf32, #tpu.memory_space<vmem>>, vector<64x32xf32>
    %cst_54 = arith.constant dense<0.000000e+00> : vector<16x32xf32>
    %154 = tpu.matmul %152, %153, %cst_54 {dimension_numbers = #tpu.dot_dimension_numbers<[1], [0], [0], [1], [0, 0, 1, 1], [], []>} : vector<16x64xf32>, vector<64x32xf32>, vector<16x32xf32> -> vector<16x32xf32>
    %155 = vector.broadcast %9 : vector<1x32xf32> to vector<16x32xf32>
    %156 = arith.addf %154, %155 : vector<16x32xf32>
    %157 = arith.addf %156, %141 : vector<16x32xf32>
    %cst_55 = arith.constant dense<0.000000e+00> : vector<16xf32>
    %158 = vector.multi_reduction <add>, %157, %cst_55 [1] : vector<16x32xf32> to vector<16xf32>
    %159 = vector.shape_cast %158 : vector<16xf32> to vector<16x1xf32>
    %cst_56 = arith.constant 3.200000e+01 : f32
    %160 = vector.broadcast %cst_56 : f32 to vector<16x1xf32>
    %161 = arith.divf %159, %160 : vector<16x1xf32>
    %162 = vector.broadcast %161 : vector<16x1xf32> to vector<16x32xf32>
    %163 = arith.subf %157, %162 : vector<16x32xf32>
    %164 = arith.mulf %163, %163 : vector<16x32xf32>
    %cst_57 = arith.constant dense<0.000000e+00> : vector<16xf32>
    %165 = vector.multi_reduction <add>, %164, %cst_57 [1] : vector<16x32xf32> to vector<16xf32>
    %166 = vector.shape_cast %165 : vector<16xf32> to vector<16x1xf32>
    %cst_58 = arith.constant 3.200000e+01 : f32
    %167 = vector.broadcast %cst_58 : f32 to vector<16x1xf32>
    %168 = arith.divf %166, %167 : vector<16x1xf32>
    %cst_59 = arith.constant 9.99999996E-13 : f32
    %169 = vector.broadcast %cst_59 : f32 to vector<16x1xf32>
    %170 = arith.addf %168, %169 : vector<16x1xf32>
    %171 = math.rsqrt %170 : vector<16x1xf32>
    %172 = vector.broadcast %161 : vector<16x1xf32> to vector<16x32xf32>
    %173 = arith.subf %157, %172 : vector<16x32xf32>
    %174 = vector.broadcast %171 : vector<16x1xf32> to vector<16x32xf32>
    %175 = arith.mulf %173, %174 : vector<16x32xf32>
    %176 = vector.broadcast %10 : vector<1x32xf32> to vector<16x32xf32>
    %177 = arith.mulf %175, %176 : vector<16x32xf32>
    %178 = vector.broadcast %11 : vector<1x32xf32> to vector<16x32xf32>
    %179 = arith.addf %177, %178 : vector<16x32xf32>
    %180 = vector.extract_strided_slice %179 {offsets = [0, 0], sizes = [8, 32], strides = [1, 1]} : vector<16x32xf32> to vector<8x32xf32>
    %181 = vector.extract_strided_slice %179 {offsets = [8, 0], sizes = [8, 32], strides = [1, 1]} : vector<16x32xf32> to vector<8x32xf32>
    %182 = vector.extract_strided_slice %43 {offsets = [0, 0, 0], sizes = [1, 8, 8], strides = [1, 1, 1]} : vector<2x8x8xf32> to vector<1x8x8xf32>
    %183 = vector.shape_cast %182 : vector<1x8x8xf32> to vector<8x8xf32>
    %184 = vector.extract_strided_slice %65 {offsets = [0, 0, 0], sizes = [1, 8, 8], strides = [1, 1, 1]} : vector<2x8x8xf32> to vector<1x8x8xf32>
    %185 = vector.shape_cast %184 : vector<1x8x8xf32> to vector<8x8xf32>
    %186 = vector.extract_strided_slice %88 {offsets = [0, 0, 0], sizes = [1, 8, 8], strides = [1, 1, 1]} : vector<2x8x8xf32> to vector<1x8x8xf32>
    %187 = vector.shape_cast %186 : vector<1x8x8xf32> to vector<8x8xf32>
    %188 = vector.extract_strided_slice %111 {offsets = [0, 0, 0], sizes = [1, 8, 8], strides = [1, 1, 1]} : vector<2x8x8xf32> to vector<1x8x8xf32>
    %189 = vector.shape_cast %188 : vector<1x8x8xf32> to vector<8x8xf32>
    %190 = vector.extract_strided_slice %43 {offsets = [1, 0, 0], sizes = [1, 8, 8], strides = [1, 1, 1]} : vector<2x8x8xf32> to vector<1x8x8xf32>
    %191 = vector.shape_cast %190 : vector<1x8x8xf32> to vector<8x8xf32>
    %192 = vector.extract_strided_slice %65 {offsets = [1, 0, 0], sizes = [1, 8, 8], strides = [1, 1, 1]} : vector<2x8x8xf32> to vector<1x8x8xf32>
    %193 = vector.shape_cast %192 : vector<1x8x8xf32> to vector<8x8xf32>
    %194 = vector.extract_strided_slice %88 {offsets = [1, 0, 0], sizes = [1, 8, 8], strides = [1, 1, 1]} : vector<2x8x8xf32> to vector<1x8x8xf32>
    %195 = vector.shape_cast %194 : vector<1x8x8xf32> to vector<8x8xf32>
    %196 = vector.extract_strided_slice %111 {offsets = [1, 0, 0], sizes = [1, 8, 8], strides = [1, 1, 1]} : vector<2x8x8xf32> to vector<1x8x8xf32>
    %197 = vector.shape_cast %196 : vector<1x8x8xf32> to vector<8x8xf32>
    %198 = tpu.concatenate %180, %181, %183, %185, %187, %189, %191, %193, %195, %197 in 1 : vector<8x32xf32>, vector<8x32xf32>, vector<8x8xf32>, vector<8x8xf32>, vector<8x8xf32>, vector<8x8xf32>, vector<8x8xf32>, vector<8x8xf32>, vector<8x8xf32>, vector<8x8xf32> -> vector<8x128xf32>
    %c0_60 = arith.constant 0 : index
    %c0_61 = arith.constant 0 : index
    %199 = vector.load %arg5[%c0_60, %c0_61] : memref<8x128xf32, #tpu.memory_space<vmem>>, vector<8x128xf32>
    tpu.vector_store %arg5[%c0_60, %c0_61], %198 {strides = array<i32>} : memref<8x128xf32, #tpu.memory_space<vmem>>, vector<8x128xf32>,
    return
  }
  func.func @transform_0(%arg0: i32) -> (i32, i32) {
    %c0_i32 = arith.constant 0 : i32
    %c0_i32_0 = arith.constant 0 : i32
    %c0_i32_1 = arith.constant 0 : i32
    return %c0_i32, %c0_i32_0 : i32, i32
  }
  func.func @transform_1(%arg0: i32) -> (i32, i32) {
    %c0_i32 = arith.constant 0 : i32
    %c0_i32_0 = arith.constant 0 : i32
    %c0_i32_1 = arith.constant 0 : i32
    return %c0_i32, %c0_i32_0 : i32, i32
  }
  func.func @transform_2(%arg0: i32) -> (i32, i32) {
    %c0_i32 = arith.constant 0 : i32
    %c0_i32_0 = arith.constant 0 : i32
    %c0_i32_1 = arith.constant 0 : i32
    return %c0_i32, %c0_i32_0 : i32, i32
  }
  func.func @transform_3(%arg0: i32) -> (i32, i32) {
    %c0_i32 = arith.constant 0 : i32
    %c0_i32_0 = arith.constant 0 : i32
    %c0_i32_1 = arith.constant 0 : i32
    return %c0_i32, %c0_i32_0 : i32, i32
  }
  func.func @transform_4(%arg0: i32) -> (i32, i32) {
    %c0_i32 = arith.constant 0 : i32
    %c0_i32_0 = arith.constant 0 : i32
    %c0_i32_1 = arith.constant 0 : i32
    return %c0_i32, %c0_i32_0 : i32, i32
  }
}

</mosaic_0001>

<bundles_post_ra>
// kernel: tpu_custom_call.1
= control target key start
LH: loop header
LB: loop body
LE: loop exit
PB: predicated region body
PF: predicated region fallthrough
CT: control target
= control target key end

     0   :  { %vm37_vm0 = vcmask 261120   ;;  %s2907_s0 = inlined_call_operand.vmem [shape: f32[16,32], index: 0, kind: input, shape index: {}]   ;;  %s2908_s1 = inlined_call_operand.vmem [shape: f32[1,368], index: 1, kind: input, shape index: {}]   ;;  %s2909_s2 = inlined_call_operand.vmem [shape: f32[32,192], index: 2, kind: input, shape index: {}]   ;;  %s2910_s3 = inlined_call_operand.vmem [shape: f32[64,32], index: 3, kind: input, shape index: {}]   ;;  %s2911_s4 = inlined_call_operand.hbm [shape: f32[8,128], index: 4, kind: output, shape index: {}]  }
   0x1   :  { %v2566_v0 = vld [vmem:[%s2909_s2] sm:$0xff]  ;;  %v2571_v1 = vld [vmem:[%s2909_s2 + $0x10] sm:$0xff] }
   0x2   :  { %v2576_v2 = vld [vmem:[%s2909_s2 + $0x20] sm:$0xff]  ;;  %v2402_v3 = vpack.c.bf16 %v2571_v1, %v2566_v0  ;;  %v2583_v4 = vld [vmem:[%s2909_s2 + $0x30] sm:$0xff] }
   0x3   :  { %v2588_v5 = vld [vmem:[%s2907_s0] sm:$0xff]  ;;  %v2406_v6 = vpack.c.bf16 %v2583_v4, %v2576_v2 }
   0x4   :  { %2269 = vmatprep.mubr.msk.f32.mxu1 %vm37_vm0, %v2588_v5 }
   0x5   :  { %9 = vsyncpa [#allocation3], 0  ;;  %2403 = vmatprep.subr.bf16.mxu1 %v2402_v3  ;;  %v2597_v7 = vld [vmem:[%s2907_s0 + $0x8] sm:$0xff]  ;;  %v2604_v8 = vld [vmem:[%s2908_s1 + $0x2] sm:$0x1]  ;;  %s2523_s29 = smov 120   ;;  %v286_v10 = vlaneseq }
   0x6   :  { %2405 = vmatpush3.bf16.msra.mxu1 %v2402_v3  ;;  %120 = vrot.lane.b32.xlu1 %v2604_v8, %s2523_s29  ;;  %v2524_v9 = vmov 0.0   ;;  %vm2525_vm1 = vmmov 0   ;;  %v123_v12 = vsub.f32 1.0, %v2604_v8  ;;  %v2618_v14 = vld [vmem:[%s2908_s1] ss:$0 sm:$0xff]  ;;  %s2526_s5 = smov 96  }
   0x7   :  { %2407 = vmatprep.subr.bf16.mxu1 %v2406_v6  ;;  %2282 = vmatprep.subr.mxu0 %v2524_v9  ;;  %v287_v11 = vshrl.u32 %v286_v10, 7  ;;  %s2527_s6 = smov 32   ;;  %vm130_vm2 = vcmask 64512   ;;  %s2528_s7 = smov 64   ;;  %vm1976_vm3 = vcmask 523264   ;;  %vm2126_vm4 = vcmask 588800  }
   0x8   :  { %2284 = vmatprep.mubr.msk.f32.mxu0 %vm2525_vm1, %v2524_v9  ;;  %v125_v19 = vmul.f32 -10000.0, %v123_v12  ;;  %s2529_s8 = smov 88   ;;  %s2530_s9 = smov 80   ;;  %vm2128_vm5 = vcmask 654336   ;;  %vm2130_vm6 = vcmask 719872   ;;  %vm2132_vm7 = vcmask 785408  }
   0x9   :  { %v2620_v15 = vsub.s32 0, %v287_v11  ;;  %s2531_s10 = smov 112   ;;  %s2532_s11 = smov 56   ;;  %vm2134_vm8 = vcmask 850944   ;;  %vm2136_vm9 = vcmask 916480   ;;  %vm2138_vm10 = vcmask 982016  }
   0xa   :  { %2409 = vmatpush3.bf16.msra.mxu1 %v2406_v6  ;;  %s2533_s12 = smov 48   ;;  %s2534_s13 = smov 72  }
   0xb   :  { %2272 = vmatprep.subr.mxu1 %v2524_v9  ;;  %v289_v23 = vrot.slane %v125_v19, %v2620_v15  ;;  %s2535_s14 = smov 104   ;;  %s2536_s15 = smov 40  }
   0xd   :  { %2270 = vmatmul.mubr.msk.f32.vlgmr.msra.gmra.mrb[0].mxu1 %vm37_vm0, %v2597_v7 }
   0xe   :  { %2274 = vmatprep.mubr.msk.f32.mxu1 %vm2525_vm1, %v2524_v9 }
  0x78   :  { %v121_v13 = vpop.permute.xlu1 %120 }
  0x79   :  { %v124_v16 = vsub.f32 1.0, %v121_v13 }
  0x7b   :  { %v126_v20 = vmul.f32 -10000.0, %v124_v16 }
  0x7d   :  { %v293_v22 = vrot.slane %v126_v20, %v2620_v15 }
  0x7f   :  { %296 = vrot.lane.b32.xlu1 %v293_v22, %s2527_s6 }
  0x83   :  { %294 = vrot.lane.b32.xlu1 %v289_v23, %s2527_s6 }
  0xe0   :  { %v2271_v17 = vpop.f32.mrb[0].mxu1 }
  0xe1   :  { %v110_v18 = vpop.f32.mrb[1].mxu1  ;;  %v2631_v24 = vadd.f32 %v2271_v17, %v2618_v14 }
  0xe2   :  { %v2623_v21 = vadd.f32 %v2618_v14, %v110_v18 }
  0xe4   :  { %128 = vrot.lane.b32.xlu0 %v2623_v21, %s2526_s5 }
  0xe8   :  { %206 = vrot.lane.b32.xlu0 %v2631_v24, %s2526_s5 }
  0xf1   :  { %v2648_v32 = vpop.permute.xlu1 %296 }
  0xf5   :  { %v2656_v36 = vpop.permute.xlu1 %294 }
 0x156   :  { %v129_v25 = vpop.permute.xlu0 %128 }
 0x157   :  { %2273 = vmatpush3.xpose.msk.msra.mxu1 %vm130_vm2, %v129_v25 }
 0x158   :  { %2277 = vmatprep.subr.mxu1 %v2524_v9 }
 0x15a   :  { %2275 = vmatmul.mubr.msk.f32.vlgmr.msra.gmra.mrb[2].mxu1 %vm130_vm2, %v2623_v21  ;;  %v207_v26 = vpop.permute.xlu0 %206 }
 0x15b   :  { %2278 = vmatpush3.xpose.msk.msra.mxu1 %vm130_vm2, %v207_v26  ;;  %2279 = vmatprep.mubr.msk.f32.mxu1 %vm2525_vm1, %v2524_v9 }
 0x15c   :  { %2287 = vmatprep.subr.mxu1 %v2524_v9 }
 0x15e   :  { %2280 = vmatmul.mubr.msk.f32.vlgmr.msra.gmra.mrb[4].mxu1 %vm130_vm2, %v2631_v24 }
 0x15f   :  { %2289 = vmatprep.mubr.msk.f32.mxu1 %vm2525_vm1, %v2524_v9 }
 0x22d   :  { %v201_v27 = vpop.f32.mrb[2].mxu1 }
 0x22e   :  { %v2276_v28 = vpop.f32.mrb[3].mxu1  ;;  %v282_v35 = vmul.f32 0.35355338, %v201_v27 }
 0x230   :  { %v300_v37 = vadd.f32 %v2656_v36, %v282_v35 }
 0x231   :  { %v278_v29 = vpop.f32.mrb[4].mxu1 }
 0x232   :  { %v283_v30 = vmul.f32 0.35355338, %v278_v29  ;;  %v2281_v31 = vpop.f32.mrb[5].mxu1  ;;  %v302_v38 = vsel %vm130_vm2, %v300_v37, -inf }
 0x234   :  { %v301_v33 = vadd.f32 %v2648_v32, %v283_v30 }
 0x236   :  { %v305_v34 = vsel %vm130_vm2, %v301_v33, -inf }
 0x237   :  { %306 = vmax.xlane.f32.xlu0 %v305_v34 }
 0x24d   :  { %400 = vrot.lane.b32.xlu0 %v2631_v24, %s2528_s7 }
 0x251   :  { %556 = vrot.lane.b32.xlu0 %v2631_v24, %s2529_s8 }
 0x270   :  { %303 = vmax.xlane.f32.xlu0 %v302_v38 }
 0x286   :  { %324 = vrot.lane.b32.xlu0 %v2623_v21, %s2528_s7 }
 0x28a   :  { %476 = vrot.lane.b32.xlu0 %v2623_v21, %s2523_s29 }
 0x2c4   :  { %v307_v39 = vpop.xlane.xlu0 %306 }
 0x2c5   :  { %v309_v40 = vsub.f32 %v301_v33, %v307_v39 }
 0x2c7   :  { %v312_v41 = vmul.f32 1.442695, %v309_v40 }
 0x2c8   :  { %v401_v42 = vpop.permute.xlu0 %400 }
 0x2c9   :  { %2455 = vpow2.f32 %v312_v41  ;;  %2288 = vmatpush3.msra.mxu1 %v401_v42 }
 0x2ca   :  { %2297 = vmatprep.subr.mxu1 %v2524_v9 }
 0x2cc   :  { %v557_v45 = vpop.permute.xlu0 %556 }
 0x2d3   :  { %v2456_v43 = vpop.eup %2455 }
 0x2d4   :  { %v317_v44 = vsel %vm130_vm2, %v2456_v43, 0.0 }
 0x2d5   :  { %318 = vadd.xlane.f32.xlu1 %v317_v44 }
 0x2e6   :  { %554 = vrot.lane.b32.xlu1 %v2631_v24, %s2523_s29 }
 0x2fd   :  { %v304_v46 = vpop.xlane.xlu0 %303 }
 0x2fe   :  { %v308_v47 = vsub.f32 %v300_v37, %v304_v46 }
 0x300   :  { %v310_v48 = vmul.f32 1.442695, %v308_v47 }
 0x301   :  { %v325_v49 = vpop.permute.xlu0 %324 }
 0x302   :  { %2457 = vpow2.f32 %v310_v48  ;;  %2283 = vmatpush3.msra.mxu0 %v325_v49 }
 0x303   :  { %2292 = vmatprep.subr.mxu0 %v2524_v9 }
 0x305   :  { %v477_v60 = vpop.permute.xlu0 %476 }
 0x30c   :  { %v2458_v50 = vpop.eup %2457 }
 0x30d   :  { %v314_v51 = vsel %vm130_vm2, %v2458_v50, 0.0 }
 0x30e   :  { %315 = vadd.xlane.f32.xlu1 %v314_v51 }
 0x31f   :  { %478 = vrot.lane.b32.xlu1 %v2623_v21, %s2529_s8 }
 0x362   :  { %v319_v52 = vpop.xlane.xlu1 %318 }
 0x363   :  { %2459 = vrcp.f32 %v319_v52 }
 0x366   :  { %v555_v55 = vpop.permute.xlu1 %554 }
 0x36d   :  { %v2460_v53 = vpop.eup %2459 }
 0x36e   :  { %v2672_v54 = vmul.f32 %v2460_v53, %v2456_v43 }
 0x370   :  { %2290 = vmatmul.mubr.msk.f32.vlgmr.msra.gmra.mrb[6].mxu1 %vm130_vm2, %v2672_v54 }
 0x371   :  { %2298 = vmatpush3.xpose.msk.msra.mxu1 %vm130_vm2, %v557_v45  ;;  %2299 = vmatprep.mubr.msk.f32.mxu1 %vm2525_vm1, %v2524_v9 }
 0x372   :  { %2307 = vmatprep.subr.mxu1 %v2524_v9 }
 0x374   :  { %2300 = vmatmul.mubr.msk.f32.vlgmr.msra.gmra.mrb[8].mxu1 %vm130_vm2, %v555_v55 }
 0x375   :  { %2309 = vmatprep.mubr.msk.f32.mxu1 %vm2525_vm1, %v2524_v9 }
 0x39b   :  { %v316_v56 = vpop.xlane.xlu1 %315 }
 0x39c   :  { %2461 = vrcp.f32 %v316_v56 }
 0x39f   :  { %v479_v59 = vpop.permute.xlu1 %478 }
 0x3a6   :  { %v2462_v57 = vpop.eup %2461 }
 0x3a7   :  { %v2683_v58 = vmul.f32 %v2462_v57, %v2458_v50 }
 0x3a9   :  { %2285 = vmatmul.mubr.msk.f32.vlgmr.msra.gmra.mrb[0].mxu0 %vm130_vm2, %v2683_v58 }
 0x3aa   :  { %2293 = vmatpush3.xpose.msk.msra.mxu0 %vm130_vm2, %v479_v59  ;;  %2294 = vmatprep.mubr.msk.f32.mxu0 %vm2525_vm1, %v2524_v9 }
 0x3ab   :  { %2302 = vmatprep.subr.mxu0 %v2524_v9 }
 0x3ad   :  { %2295 = vmatmul.mubr.msk.f32.vlgmr.msra.gmra.mrb[2].mxu0 %vm130_vm2, %v477_v60 }
 0x3ae   :  { %2304 = vmatprep.mubr.msk.f32.mxu0 %vm2525_vm1, %v2524_v9 }
 0x443   :  { %v2694_v61 = vpop.f32.mrb[6].mxu1 }
 0x444   :  { %v2291_v62 = vpop.f32.mrb[7].mxu1 }
 0x447   :  { %v628_v63 = vpop.f32.mrb[8].mxu1 }
 0x448   :  { %v633_v3 = vmul.f32 0.35355338, %v628_v63  ;;  %v2301_v6 = vpop.f32.mrb[9].mxu1 }
 0x44a   :  { %v635_v10 = vadd.f32 %v633_v3, %v2648_v32 }
 0x44c   :  { %v639_v11 = vsel %vm130_vm2, %v635_v10, -inf }
 0x44d   :  { %640 = vmax.xlane.f32.xlu1 %v639_v11 }
 0x45e   :  { %982 = vrot.lane.b32.xlu1 %v2623_v21, %s2530_s9 }
 0x462   :  { %980 = vrot.lane.b32.xlu1 %v2623_v21, %s2531_s10 }
 0x466   :  { %1058 = vrot.lane.b32.xlu1 %v2631_v24, %s2531_s10 }
 0x47c   :  { %v2704_v12 = vpop.f32.mrb[0].mxu0 }
 0x47d   :  { %v2286_v13 = vpop.f32.mrb[1].mxu0 }
 0x480   :  { %v550_v16 = vpop.f32.mrb[2].mxu0 }
 0x481   :  { %v2296_v17 = vpop.f32.mrb[3].mxu0  ;;  %v632_v25 = vmul.f32 0.35355338, %v550_v16 }
 0x483   :  { %v634_v26 = vadd.f32 %v632_v25, %v2656_v36 }
 0x485   :  { %v636_v27 = vsel %vm130_vm2, %v634_v26, -inf }
 0x4da   :  { %v641_v18 = vpop.xlane.xlu1 %640 }
 0x4db   :  { %v643_v19 = vsub.f32 %v635_v10, %v641_v18 }
 0x4dd   :  { %v646_v20 = vmul.f32 1.442695, %v643_v19 }
 0x4df   :  { %2463 = vpow2.f32 %v646_v20 }
 0x4e9   :  { %v2464_v22 = vpop.eup %2463 }
 0x4ea   :  { %v651_v23 = vsel %vm130_vm2, %v2464_v22, 0.0 }
 0x4eb   :  { %652 = vadd.xlane.f32.xlu0 %v651_v23 }
 0x501   :  { %734 = vrot.lane.b32.xlu0 %v2631_v24, %s2532_s11 }
 0x505   :  { %1060 = vrot.lane.b32.xlu0 %v2631_v24, %s2530_s9 }
 0x524   :  { %637 = vmax.xlane.f32.xlu0 %v636_v27 }
 0x53a   :  { %658 = vrot.lane.b32.xlu0 %v2623_v21, %s2532_s11 }
 0x53e   :  { %896 = vrot.lane.b32.xlu0 %v2566_v0, %s2527_s6  ;;  %v983_v0 = vpop.permute.xlu1 %982 }
 0x542   :  { %1162 = vrot.lane.b32.xlu0 %v2623_v21, %s2533_s12 }
 0x546   :  { %1238 = vrot.lane.b32.xlu0 %v2631_v24, %s2533_s12 }
 0x54a   :  { %1315 = vrot.lane.b32.xlu0 %v2576_v2, %s2527_s6  ;;  %v981_v2 = vpop.permute.xlu1 %980 }
 0x54e   :  { %1403 = vrot.lane.b32.xlu0 %v2623_v21, %s2534_s13  ;;  %v1059_v34 = vpop.permute.xlu1 %1058 }
 0x552   :  { %1401 = vrot.lane.b32.xlu0 %v2623_v21, %s2535_s14 }
 0x578   :  { %v653_v28 = vpop.xlane.xlu0 %652 }
 0x579   :  { %2465 = vrcp.f32 %v653_v28 }
 0x57c   :  { %v735_v29 = vpop.permute.xlu0 %734 }
 0x57d   :  { %2308 = vmatpush3.msra.mxu1 %v735_v29 }
 0x57e   :  { %2322 = vmatprep.subr.mxu1 %v2524_v9 }
 0x580   :  { %v1061_v33 = vpop.permute.xlu0 %1060 }
 0x583   :  { %v2466_v30 = vpop.eup %2465 }
 0x584   :  { %v2724_v31 = vmul.f32 %v2466_v30, %v2464_v22 }
 0x586   :  { %2310 = vmatmul.mubr.msk.f32.vlgmr.msra.gmra.mrb[10].mxu1 %vm130_vm2, %v2724_v31 }
 0x587   :  { %2323 = vmatpush3.xpose.msk.msra.mxu1 %vm130_vm2, %v983_v0  ;;  %2324 = vmatprep.mubr.msk.f32.mxu1 %vm2525_vm1, %v2524_v9 }
 0x588   :  { %2327 = vmatprep.subr.mxu1 %v2524_v9 }
 0x58a   :  { %2325 = vmatmul.mubr.msk.f32.vlgmr.msra.gmra.mrb[12].mxu1 %vm130_vm2, %v981_v2 }
 0x58b   :  { %2328 = vmatpush3.xpose.msk.msra.mxu1 %vm130_vm2, %v1061_v33  ;;  %2329 = vmatprep.mubr.msk.f32.mxu1 %vm2525_vm1, %v2524_v9 }
 0x58c   :  { %2337 = vmatprep.subr.mxu1 %v2524_v9 }
 0x58e   :  { %2330 = vmatmul.mubr.msk.f32.vlgmr.msra.gmra.mrb[14].mxu1 %vm130_vm2, %v1059_v34 }
 0x58f   :  { %2339 = vmatprep.mubr.msk.f32.mxu1 %vm2525_vm1, %v2524_v9 }
 0x5b1   :  { %v638_v35 = vpop.xlane.xlu0 %637 }
 0x5b2   :  { %v642_v37 = vsub.f32 %v634_v26, %v638_v35 }
 0x5b4   :  { %v644_v38 = vmul.f32 1.442695, %v642_v37 }
 0x5b5   :  { %v659_v39 = vpop.permute.xlu0 %658 }
 0x5b6   :  { %2467 = vpow2.f32 %v644_v38  ;;  %2303 = vmatpush3.msra.mxu0 %v659_v39 }
 0x5b9   :  { %v897_v40 = vpop.permute.xlu0 %896 }
 0x5bd   :  { %v2740_v41 = vpop.permute.xlu0 %1162 }
 0x5c0   :  { %v2468_v42 = vpop.eup %2467 }
 0x5c1   :  { %v1239_v43 = vpop.permute.xlu0 %1238  ;;  %v648_v44 = vsel %vm130_vm2, %v2468_v42, 0.0 }
 0x5c2   :  { %649 = vadd.xlane.f32.xlu1 %v648_v44  ;;  %2338 = vmatpush3.msra.mxu1 %v1239_v43 }
 0x5c3   :  { %2347 = vmatprep.subr.mxu1 %v2524_v9 }
 0x5c5   :  { %v1316_v27 = vpop.permute.xlu0 %1315 }
 0x5c9   :  { %v1404_v28 = vpop.permute.xlu0 %1403 }
 0x64f   :  { %v650_v45 = vpop.xlane.xlu1 %649 }
 0x650   :  { %2469 = vrcp.f32 %v650_v45 }
 0x659   :  { %v806_v46 = vpop.f32.mrb[10].mxu1 }
 0x65a   :  { %v2470_v47 = vpop.eup %2469  ;;  %v2311_v48 = vpop.f32.mrb[11].mxu1 }
 0x65b   :  { %v2744_v49 = vmul.f32 %v2470_v47, %v2468_v42 }
 0x65d   :  { %2305 = vmatmul.mubr.msk.f32.vlgmr.msra.gmra.mrb[4].mxu0 %vm130_vm2, %v2744_v49  ;;  %v1054_v50 = vpop.f32.mrb[12].mxu1 }
 0x65e   :  { %v1136_v51 = vmul.f32 0.35355338, %v1054_v50  ;;  %v2326_v52 = vpop.f32.mrb[13].mxu1 }
 0x660   :  { %v1138_v53 = vadd.f32 %v1136_v51, %v2656_v36 }
 0x661   :  { %v1132_v55 = vpop.f32.mrb[14].mxu1 }
 0x662   :  { %v1137_v56 = vmul.f32 0.35355338, %v1132_v55  ;;  %v2331_v57 = vpop.f32.mrb[15].mxu1  ;;  %v1140_v59 = vsel %vm130_vm2, %v1138_v53, -inf }
 0x663   :  { %1141 = vmax.xlane.f32.xlu1 %v1140_v59 }
 0x664   :  { %v1139_v60 = vadd.f32 %v1137_v56, %v2648_v32 }
 0x666   :  { %v1143_v62 = vsel %vm130_vm2, %v1139_v60, -inf }
 0x667   :  { %1144 = vmax.xlane.f32.xlu1 %v1143_v62 }
 0x6f0   :  { %v1142_v63 = vpop.xlane.xlu1 %1141 }
 0x6f1   :  { %v1146_v3 = vsub.f32 %v1138_v53, %v1142_v63 }
 0x6f3   :  { %v1148_v6 = vmul.f32 1.442695, %v1146_v3 }
 0x6f4   :  { %v1145_v10 = vpop.xlane.xlu1 %1144 }
 0x6f5   :  { %2471 = vpow2.f32 %v1148_v6  ;;  %v1147_v11 = vsub.f32 %v1139_v60, %v1145_v10 }
 0x6f7   :  { %v1150_v13 = vmul.f32 1.442695, %v1147_v11 }
 0x6f9   :  { %2473 = vpow2.f32 %v1150_v13 }
 0x6ff   :  { %v2472_v16 = vpop.eup %2471 }
 0x700   :  { %v1152_v17 = vsel %vm130_vm2, %v2472_v16, 0.0 }
 0x701   :  { %1153 = vadd.xlane.f32.xlu1 %v1152_v17 }
 0x703   :  { %v2474_v18 = vpop.eup %2473 }
 0x704   :  { %v1155_v19 = vsel %vm130_vm2, %v2474_v18, 0.0 }
 0x705   :  { %1156 = vadd.xlane.f32.xlu1 %v1155_v19 }
 0x716   :  { %811 = vrot.lane.b32.xlu1 %v2571_v1, %s2527_s6 }
 0x71a   :  { %1481 = vrot.lane.b32.xlu1 %v2631_v24, %s2534_s13 }
 0x71e   :  { %1479 = vrot.lane.b32.xlu1 %v2631_v24, %s2535_s14 }
 0x730   :  { %v730_v20 = vpop.f32.mrb[4].mxu0 }
 0x731   :  { %v2306_v22 = vpop.f32.mrb[5].mxu0  ;;  %2314 = vmatprep.mubr.msk.f32.mxu0 %vm130_vm2, %v730_v20 }
 0x78e   :  { %v1154_v23 = vpop.xlane.xlu1 %1153 }
 0x792   :  { %v1157_v25 = vpop.xlane.xlu1 %1156 }
 0x793   :  { %2475 = vrcp.f32 %v1157_v25 }
 0x794   :  { %2477 = vrcp.f32 %v1154_v23 }
 0x796   :  { %v812_v26 = vpop.permute.xlu1 %811 }
 0x797   :  { %2312 = vmatprep.subr.mxu0 %v812_v26 }
 0x798   :  { %2313 = vmatpush3.msra.mxu0 %v812_v26  ;;  %v2190_v26 = vld [vmem:[%s2908_s1 + $0x1] ss:$0 sm:$0xff] }
 0x799   :  { %2315 = vmatmul.mubr.msk.f32.vlgmr.msra.gmra.mrb[6].mxu0 %vm130_vm2, %v806_v46  ;;  %2317 = vmatprep.subr.mxu0 %v897_v40 }
 0x79a   :  { %2319 = vmatprep.mubr.msk.f32.mxu0 %vm130_vm2, %v2704_v12  ;;  %2318 = vmatpush3.msra.mxu0 %v897_v40  ;;  %v1402_v12 = vpop.permute.xlu0 %1401  ;;  %v1482_v33 = vpop.permute.xlu1 %1481 }
 0x79b   :  { %2332 = vmatprep.subr.mxu0 %v2524_v9 }
 0x79d   :  { %v2476_v1 = vpop.eup %2475 }
 0x79e   :  { %v2765_v29 = vmul.f32 %v2476_v1, %v2474_v18  ;;  %v2478_v0 = vpop.eup %2477  ;;  %v1480_v42 = vpop.permute.xlu1 %1479 }
 0x79f   :  { %v2775_v30 = vmul.f32 %v2478_v0, %v2472_v16 }
 0x7a0   :  { %2340 = vmatmul.mubr.msk.f32.vlgmr.msra.gmra.mrb[16].mxu1 %vm130_vm2, %v2765_v29 }
 0x7a1   :  { %2348 = vmatpush3.xpose.msk.msra.mxu1 %vm130_vm2, %v1404_v28  ;;  %2320 = vmatmul.mubr.msk.f32.vlgmr.msra.gmra.mrb[6].mxu0 %vm130_vm2, %v2694_v61 }
 0x7a2   :  { %2333 = vmatpush3.msra.mxu0 %v2740_v41  ;;  %2349 = vmatprep.mubr.msk.f32.mxu1 %vm2525_vm1, %v2524_v9 }
 0x7a3   :  { %2334 = vmatprep.mubr.msk.f32.mxu0 %vm2525_vm1, %v2524_v9  ;;  %2342 = vmatprep.subr.mxu0 %v1316_v27 }
 0x7a4   :  { %2350 = vmatmul.mubr.msk.f32.vlgmr.msra.gmra.mrb[18].mxu1 %vm130_vm2, %v1402_v12  ;;  %2357 = vmatprep.subr.mxu1 %v2524_v9 }
 0x7a5   :  { %2335 = vmatmul.mubr.msk.f32.vlgmr.msra.gmra.mrb[8].mxu0 %vm130_vm2, %v2775_v30  ;;  %2359 = vmatprep.mubr.msk.f32.mxu1 %vm2525_vm1, %v2524_v9 }
 0x7a6   :  { %2343 = vmatpush3.msra.mxu0 %v1316_v27 }
 0x7a7   :  { %2352 = vmatprep.subr.mxu0 %v2524_v9 }
 0x873   :  { %v1310_v61 = vpop.f32.mrb[16].mxu1 }
 0x874   :  { %v2341_v2 = vpop.f32.mrb[17].mxu1 }
 0x877   :  { %v1475_v34 = vpop.f32.mrb[18].mxu1 }
 0x878   :  { %v1557_v35 = vmul.f32 0.35355338, %v1475_v34  ;;  %v1234_v37 = vpop.f32.mrb[8].mxu0  ;;  %v2351_v38 = vpop.f32.mrb[19].mxu1  ;;  %v24_v34 = vld [vmem:[%s2909_s2 + $0x8] sm:$0xff] }
 0x879   :  { %v2336_v39 = vpop.f32.mrb[9].mxu0  ;;  %2344 = vmatprep.mubr.msk.f32.mxu0 %vm130_vm2, %v1234_v37  ;;  %v26_v38 = vld [vmem:[%s2909_s2 + $0x28] sm:$0xff] }
 0x87a   :  { %2345 = vmatmul.mubr.msk.f32.vlgmr.msra.gmra.mrb[6].mxu0 %vm130_vm2, %v1310_v61  ;;  %v1559_v40 = vadd.f32 %v1557_v35, %v2656_v36  ;;  %v25_v35 = vld [vmem:[%s2909_s2 + $0x18] sm:$0xff] }
 0x87b   :  { %2353 = vmatpush3.xpose.msk.msra.mxu0 %vm130_vm2, %v1482_v33  ;;  %2354 = vmatprep.mubr.msk.f32.mxu0 %vm2525_vm1, %v2524_v9  ;;  %v2410_v37 = vpack.c.bf16 %v25_v35, %v24_v34  ;;  %v27_v39 = vld [vmem:[%s2909_s2 + $0x38] sm:$0xff] }
 0x87c   :  { %v1561_v41 = vsel %vm130_vm2, %v1559_v40, -inf  ;;  %2362 = vmatprep.subr.mxu0 %v2524_v9 }
 0x87d   :  { %1562 = vmax.xlane.f32.xlu0 %v1561_v41 }
 0x87e   :  { %2355 = vmatmul.mubr.msk.f32.vlgmr.msra.gmra.mrb[10].mxu0 %vm130_vm2, %v1480_v42 }
 0x87f   :  { %2364 = vmatprep.mubr.msk.f32.mxu0 %vm2525_vm1, %v2524_v9 }
 0x90a   :  { %v1563_v43 = vpop.xlane.xlu0 %1562 }
 0x90b   :  { %v1567_v44 = vsub.f32 %v1559_v40, %v1563_v43  ;;  %v2414_v40 = vpack.c.bf16 %v27_v39, %v26_v38 }
 0x90d   :  { %v1569_v45 = vmul.f32 1.442695, %v1567_v44 }
 0x90f   :  { %2479 = vpow2.f32 %v1569_v45 }
 0x919   :  { %v2480_v36 = vpop.eup %2479 }
 0x91a   :  { %v1573_v46 = vsel %vm130_vm2, %v2480_v36, 0.0 }
 0x91b   :  { %1574 = vadd.xlane.f32.xlu0 %v1573_v46 }
 0x951   :  { %v1553_v47 = vpop.f32.mrb[10].mxu0 }
 0x952   :  { %v1558_v48 = vmul.f32 0.35355338, %v1553_v47  ;;  %v2356_v50 = vpop.f32.mrb[11].mxu0 }
 0x954   :  { %v1560_v51 = vadd.f32 %v1558_v48, %v2648_v32 }
 0x956   :  { %v1564_v52 = vsel %vm130_vm2, %v1560_v51, -inf }
 0x957   :  { %1565 = vmax.xlane.f32.xlu1 %v1564_v52 }
 0x968   :  { %1583 = vrot.lane.b32.xlu1 %v2623_v21, %s2536_s15 }
 0x96c   :  { %1736 = vrot.lane.b32.xlu1 %v2583_v4, %s2527_s6 }
 0x970   :  { %1822 = vrot.lane.b32.xlu1 %v2618_v14, %s2527_s6 }
 0x9a8   :  { %v1575_v9 = vpop.xlane.xlu0 %1574 }
 0x9a9   :  { %2481 = vrcp.f32 %v1575_v9 }
 0x9b3   :  { %v2482_v55 = vpop.eup %2481 }
 0x9b4   :  { %v2805_v59 = vmul.f32 %v2482_v55, %v2480_v36 }
 0x9e4   :  { %v1566_v53 = vpop.xlane.xlu1 %1565 }
 0x9e5   :  { %v1568_v56 = vsub.f32 %v1560_v51, %v1566_v53 }
 0x9e7   :  { %v1571_v57 = vmul.f32 1.442695, %v1568_v56  ;;  %v1963_v56 = vld [vmem:[%s2910_s3] sm:$0xff] }
 0x9e8   :  { %v1584_v32 = vpop.permute.xlu1 %1583 }
 0x9e9   :  { %2483 = vpow2.f32 %v1571_v57  ;;  %2358 = vmatpush3.msra.mxu1 %v1584_v32  ;;  %v1964_v57 = vld [vmem:[%s2910_s3 + $0x8] sm:$0xff] }
 0x9ea   :  { %2360 = vmatmul.mubr.msk.f32.vlgmr.msra.gmra.mrb[20].mxu1 %vm130_vm2, %v2805_v59  ;;  %2411 = vmatprep.subr.bf16.mxu1 %v2410_v37  ;;  %v2418_v32 = vpack.c.bf16 %v1964_v57, %v1963_v56 }
 0x9eb   :  { %2413 = vmatpush3.bf16.msra.mxu1 %v2410_v37 }
 0x9ec   :  { %v1737_v60 = vpop.permute.xlu1 %1736  ;;  %2415 = vmatprep.subr.bf16.mxu1 %v2414_v40 }
 0x9ef   :  { %2417 = vmatpush3.bf16.msra.mxu1 %v2414_v40 }
 0x9f3   :  { %v2484_v21 = vpop.eup %2483 }
 0x9f4   :  { %v1576_v4 = vsel %vm130_vm2, %v2484_v21, 0.0 }
 0x9f5   :  { %1577 = vadd.xlane.f32.xlu0 %v1576_v4  ;;  %v1966_v4 = vld [vmem:[%s2910_s3 + $0x18] sm:$0xff] }
 0xa0b   :  { %1659 = vrot.lane.b32.xlu0 %v2631_v24, %s2536_s15  ;;  %v1823_v24 = vpop.permute.xlu1 %1822 }
 0xa82   :  { %v1578_v14 = vpop.xlane.xlu0 %1577 }
 0xa83   :  { %2485 = vrcp.f32 %v1578_v14 }
 0xa86   :  { %v1660_v62 = vpop.permute.xlu0 %1659 }
 0xa87   :  { %2363 = vmatpush3.msra.mxu0 %v1660_v62  ;;  %v1968_v62 = vld [vmem:[%s2910_s3 + $0x28] sm:$0xff] }
 0xa88   :  { %2367 = vmatprep.subr.mxu0 %v1737_v60 }
 0xa8d   :  { %v2486_v63 = vpop.eup %2485 }
 0xa8e   :  { %v2811_v3 = vmul.f32 %v2486_v63, %v2484_v21  ;;  %v1965_v21 = vld [vmem:[%s2910_s3 + $0x10] sm:$0xff] }
 0xa8f   :  { %v2422_v14 = vpack.c.bf16 %v1966_v4, %v1965_v21 }
 0xa90   :  { %2365 = vmatmul.mubr.msk.f32.vlgmr.msra.gmra.mrb[12].mxu0 %vm130_vm2, %v2811_v3 }
 0xa91   :  { %2368 = vmatpush3.msra.mxu0 %v1737_v60  ;;  %v1967_v60 = vld [vmem:[%s2910_s3 + $0x20] sm:$0xff] }
 0xa92   :  { %2419 = vmatprep.subr.bf16.mxu0 %v2418_v32  ;;  %v2426_v63 = vpack.c.bf16 %v1968_v62, %v1967_v60 }
 0xabd   :  { %v1655_v6 = vpop.f32.mrb[20].mxu1 }
 0xabe   :  { %v2361_v10 = vpop.f32.mrb[21].mxu1  ;;  %2369 = vmatprep.mubr.msk.f32.mxu0 %vm130_vm2, %v1655_v6  ;;  %v1969_v6 = vld [vmem:[%s2910_s3 + $0x30] sm:$0xff] }
 0xabf   :  { %v1970_v10 = vld [vmem:[%s2910_s3 + $0x38] sm:$0xff]  ;;  %s2537_s3 = smov [#allocation2]  }
 0xb63   :  { %v1731_v11 = vpop.f32.mrb[12].mxu0 }
 0xb64   :  { %v2366_v13 = vpop.f32.mrb[13].mxu0  ;;  %2370 = vmatmul.mubr.msk.f32.vlgmr.msra.gmra.mrb[6].mxu0 %vm130_vm2, %v1731_v11  ;;  %v2430_v11 = vpack.c.bf16 %v1970_v10, %v1969_v6 }
 0xb65   :  { %2421 = vmatpush3.bf16.msra.mxu0 %v2418_v32 }
 0xb66   :  { %2423 = vmatprep.subr.bf16.mxu0 %v2422_v14 }
 0xb69   :  { %2425 = vmatpush3.bf16.msra.mxu0 %v2422_v14 }
 0xb6a   :  { %2427 = vmatprep.subr.bf16.mxu0 %v2426_v63 }
 0xb6d   :  { %2429 = vmatpush3.bf16.msra.mxu0 %v2426_v63 }
 0xb6e   :  { %2431 = vmatprep.subr.bf16.mxu0 %v2430_v11 }
 0xb71   :  { %2433 = vmatpush3.bf16.msra.mxu0 %v2430_v11 }
 0xc37   :  { %v2371_v16 = vpop.f32.mrb[6].mxu0 }
 0xc38   :  { %v1826_v17 = vadd.f32 %v2371_v16, %v1823_v24  ;;  %v1811_v18 = vpop.f32.mrb[7].mxu0 }
 0xc39   :  { %v1825_v19 = vadd.f32 %v1823_v24, %v1811_v18 }
 0xc3a   :  { %v1828_v20 = vadd.f32 %v1826_v17, %v2597_v7 }
 0xc3b   :  { %v1827_v22 = vadd.f32 %v1825_v19, %v2588_v5 }
 0xc3c   :  { %v1832_v23 = vsel %vm37_vm0, %v1828_v20, 0.0 }
 0xc3d   :  { %1833 = vadd.xlane.f32.xlu1 %v1832_v23  ;;  %v1829_v25 = vsel %vm37_vm0, %v1827_v22, 0.0 }
 0xc3e   :  { %1830 = vadd.xlane.f32.xlu0 %v1829_v25 }
 0xc4e   :  { %1864 = vrot.lane.b32.xlu1 %v2190_v26, %s2526_s5 }
 0xcca   :  { %v1834_v27 = vpop.xlane.xlu1 %1833 }
 0xccb   :  { %v1837_v1 = vmul.f32 0.03125, %v1834_v27  ;;  %v1831_v28 = vpop.xlane.xlu0 %1830 }
 0xccc   :  { %v1836_v0 = vmul.f32 0.03125, %v1831_v28 }
 0xccd   :  { %v1839_v12 = vsub.f32 %v1828_v20, %v1837_v1 }
 0xcce   :  { %v1838_v7 = vsub.f32 %v1827_v22, %v1836_v0  ;;  %v1865_v48 = vpop.permute.xlu1 %1864 }
 0xccf   :  { %v1841_v2 = vmul.f32 %v1839_v12, %v1839_v12 }
 0xcd0   :  { %v1840_v61 = vmul.f32 %v1838_v7, %v1838_v7 }
 0xcd1   :  { %v1845_v33 = vsel %vm37_vm0, %v1841_v2, 0.0 }
 0xcd2   :  { %v1842_v5 = vsel %vm37_vm0, %v1840_v61, 0.0 }
 0xcd3   :  { %1843 = vadd.xlane.f32.xlu0 %v1842_v5 }
 0xcd7   :  { %1846 = vadd.xlane.f32.xlu0 %v1845_v33 }
 0xced   :  { %1869 = vrot.lane.b32.xlu0 %v2190_v26, %s2528_s7 }
 0xd60   :  { %v1844_v41 = vpop.xlane.xlu0 %1843 }
 0xd61   :  { %v1848_v42 = vmul.f32 0.03125, %v1844_v41 }
 0xd63   :  { %v1850_v43 = vadd.f32 1e-12, %v1848_v42 }
 0xd64   :  { %v1847_v44 = vpop.xlane.xlu0 %1846 }
 0xd65   :  { %2487 = vrsqrt.f32 %v1850_v43  ;;  %v1849_v45 = vmul.f32 0.03125, %v1847_v44 }
 0xd67   :  { %v1851_v36 = vadd.f32 1e-12, %v1849_v45 }
 0xd68   :  { %v1870_v13 = vpop.permute.xlu0 %1869 }
 0xd69   :  { %2489 = vrsqrt.f32 %v1851_v36 }
 0xd6f   :  { %v2488_v46 = vpop.eup %2487 }
 0xd70   :  { %v1854_v47 = vmul.f32 %v2488_v46, %v1838_v7 }
 0xd72   :  { %v1862_v50 = vmul.f32 %v2190_v26, %v1854_v47 }
 0xd73   :  { %v2490_v51 = vpop.eup %2489 }
 0xd74   :  { %v1855_v52 = vmul.f32 %v2490_v51, %v1839_v12  ;;  %v1867_v9 = vadd.f32 %v1865_v48, %v1862_v50  ;;  %v1974_v12 = vrot.slane %v2604_v8, %v2620_v15 }
 0xd76   :  { %v1863_v53 = vmul.f32 %v2190_v26, %v1855_v52  ;;  %2380 = vmatprep.mubr.msk.f32.mxu1 %vm37_vm0, %v1867_v9 }
 0xd78   :  { %v1868_v55 = vadd.f32 %v1865_v48, %v1863_v53 }
 0xd7a   :  { %2381 = vmatmul.mubr.msk.f32.vlgmr.msra.gmra.mrb[22].mxu1 %vm37_vm0, %v1868_v55 }
 0xe4d   :  { %v2382_v24 = vpop.f32.mrb[22].mxu1 }
 0xe4e   :  { %v1950_v16 = vadd.f32 %v2382_v24, %v1870_v13  ;;  %v1944_v17 = vpop.f32.mrb[23].mxu1 }
 0xe4f   :  { %v1945_v18 = vadd.f32 %v1944_v17, %v1870_v13 }
 0xe50   :  { %v1956_v19 = vmul.f32 0.70710677, %v1950_v16  ;;  %v1954_v1 = vmul.f32 0.5, %v1950_v16 }
 0xe51   :  { %v1955_v20 = vmul.f32 0.70710677, %v1945_v18  ;;  %v1953_v26 = vmul.f32 0.5, %v1945_v18 }
 0xe52   :  { %2491 = verf.f32 %v1956_v19 }
 0xe53   :  { %2493 = verf.f32 %v1955_v20 }
 0xe5c   :  { %v2492_v22 = vpop.eup %2491 }
 0xe5d   :  { %v2494_v23 = vpop.eup %2493  ;;  %v1960_v25 = vadd.f32 1.0, %v2492_v22 }
 0xe5e   :  { %v1959_v27 = vadd.f32 1.0, %v2494_v23 }
 0xe5f   :  { %v1962_v0 = vmul.f32 %v1960_v25, %v1954_v1 }
 0xe60   :  { %v1961_v28 = vmul.f32 %v1959_v27, %v1953_v26 }
 0xe62   :  { %2399 = vmatprep.mubr.msk.f32.mxu0 %vm1976_vm3, %v1961_v28 }
 0xe63   :  { %2400 = vmatmul.mubr.msk.f32.vlgmr.msra.gmra.mrb[14].mxu0 %vm1976_vm3, %v1962_v0 }
 0xf36   :  { %v2401_v7 = vpop.f32.mrb[14].mxu0 }
 0xf37   :  { %v2055_v61 = vadd.f32 %v2401_v7, %v1974_v12  ;;  %v2049_v5 = vpop.f32.mrb[15].mxu0 }
 0xf38   :  { %v2050_v2 = vadd.f32 %v2049_v5, %v1974_v12 }
 0xf39   :  { %v2059_v33 = vadd.f32 %v2055_v61, %v1868_v55 }
 0xf3a   :  { %v2058_v34 = vadd.f32 %v2050_v2, %v1867_v9 }
 0xf3b   :  { %v2063_v35 = vsel %vm37_vm0, %v2059_v33, 0.0 }
 0xf3c   :  { %2064 = vadd.xlane.f32.xlu1 %v2063_v35  ;;  %v2060_v37 = vsel %vm37_vm0, %v2058_v34, 0.0 }
 0xf3d   :  { %2061 = vadd.xlane.f32.xlu0 %v2060_v37 }
 0xf53   :  { %2086 = vrot.lane.b32.xlu0 %v1974_v12, %s2526_s5 }
 0xf57   :  { %2100 = vrot.lane.b32.xlu0 %v2683_v58, %s2528_s7 }
 0xf5b   :  { %2103 = vrot.lane.b32.xlu0 %v2744_v49, %s2534_s13 }
 0xf5f   :  { %2106 = vrot.lane.b32.xlu0 %v2775_v30, %s2530_s9 }
 0xf63   :  { %2109 = vrot.lane.b32.xlu0 %v2805_v59, %s2529_s8 }
 0xf67   :  { %2112 = vrot.lane.b32.xlu0 %v2672_v54, %s2526_s5 }
 0xf6b   :  { %2115 = vrot.lane.b32.xlu0 %v2724_v31, %s2535_s14 }
 0xfc9   :  { %v2065_v8 = vpop.xlane.xlu1 %2064 }
 0xfca   :  { %v2067_v15 = vmul.f32 0.03125, %v2065_v8  ;;  %v2062_v49 = vpop.xlane.xlu0 %2061 }
 0xfcb   :  { %v2066_v30 = vmul.f32 0.03125, %v2062_v49 }
 0xfcc   :  { %v2069_v38 = vsub.f32 %v2059_v33, %v2067_v15 }
 0xfcd   :  { %v2068_v40 = vsub.f32 %v2058_v34, %v2066_v30 }
 0xfce   :  { %v2071_v39 = vmul.f32 %v2069_v38, %v2069_v38  ;;  %v2087_v45 = vpop.permute.xlu0 %2086 }
 0xfcf   :  { %v2070_v41 = vmul.f32 %v2068_v40, %v2068_v40 }
 0xfd0   :  { %v2075_v58 = vsel %vm37_vm0, %v2071_v39, 0.0 }
 0xfd1   :  { %2076 = vadd.xlane.f32.xlu1 %v2075_v58  ;;  %v2072_v59 = vsel %vm37_vm0, %v2070_v41, 0.0 }
 0xfd2   :  { %v2101_v48 = vpop.permute.xlu0 %2100 }
 0xfd6   :  { %v2104_v52 = vpop.permute.xlu0 %2103 }
 0xfda   :  { %v2107_v53 = vpop.permute.xlu0 %2106 }
 0xfde   :  { %v2110_v55 = vpop.permute.xlu0 %2109 }
 0xfe2   :  { %2091 = vrot.lane.b32.xlu1 %v1974_v12, %s2528_s7  ;;  %v2113_v57 = vpop.permute.xlu0 %2112 }
 0xfe6   :  { %v2116_v4 = vpop.permute.xlu0 %2115 }
0x1006   :  { %2073 = vadd.xlane.f32.xlu1 %v2072_v59 }
0x105e   :  { %v2077_v54 = vpop.xlane.xlu1 %2076 }
0x105f   :  { %v2079_v42 = vmul.f32 0.03125, %v2077_v54 }
0x1061   :  { %v2081_v43 = vadd.f32 1e-12, %v2079_v42 }
0x1062   :  { %v2092_v36 = vpop.permute.xlu1 %2091 }
0x1063   :  { %2495 = vrsqrt.f32 %v2081_v43 }
0x106d   :  { %v2496_v31 = vpop.eup %2495 }
0x106e   :  { %v2085_v44 = vmul.f32 %v2496_v31, %v2069_v38 }
0x1070   :  { %v2090_v46 = vmul.f32 %v2087_v45, %v2085_v44 }
0x1072   :  { %v2095_v47 = vadd.f32 %v2092_v36, %v2090_v46 }
0x1074   :  { %2097 = vrot.lane.b32.xlu0 %v2095_v47, %s2527_s6 }
0x1078   :  { %2118 = vrot.lane.b32.xlu0 %v2765_v29, %s2531_s10 }
0x107c   :  { %2121 = vrot.lane.b32.xlu0 %v2811_v3, %s2523_s29  ;;  %s2147_s29 = sshll.u32 %s2537_s3, 4  ;;  %s2148_s29 = int_to_ptr.vmem [resolvable:$true] %s2147_s29 }
0x107d   :  { %s2499_s5 = scalar_lea.vmem %s2148_s29, 128  ;;  %p2504_p1 = scmp.lt.s32.totalorder %s2148_s29, %s2148_s29 }
0x107e   :  { %p2500_p0 = scmp.ne.s32.totalorder %s2148_s29, %s2499_s5  ;;  %p2505_p2 = scmp.lt.s32.totalorder %s2499_s5, %s2499_s5 }
0x1080   :  { %p2506_p3 = por %p2505_p2, %p2504_p1 }
0x1082   :  { %p2507_p4 = pnand %p2506_p3, %p2500_p0 }
0x1093   :  { %v2074_v50 = vpop.xlane.xlu1 %2073 }
0x1094   :  { %v2078_v51 = vmul.f32 0.03125, %v2074_v50 }
0x1096   :  { %v2080_v9 = vadd.f32 1e-12, %v2078_v51 }
0x1098   :  { %2497 = vrsqrt.f32 %v2080_v9 }
0x10a2   :  { %v2498_v56 = vpop.eup %2497 }
0x10a3   :  { %v2084_v32 = vmul.f32 %v2498_v56, %v2068_v40 }
0x10a5   :  { %v2089_v21 = vmul.f32 %v2087_v45, %v2084_v32 }
0x10a7   :  { %v2094_v14 = vadd.f32 %v2092_v36, %v2089_v21 }
0x10e6   :  { %v2098_v60 = vpop.permute.xlu0 %2097 }
0x10e7   :  { %v2124_v29 = vsel %vm37_vm0, %v2094_v14, %v2098_v60 }
0x10e8   :  { %v2125_v3 = vsel %vm1976_vm3, %v2124_v29, %v2101_v48 }
0x10e9   :  { %v2127_v62 = vsel %vm2126_vm4, %v2125_v3, %v2104_v52 }
0x10ea   :  { %v2129_v63 = vsel %vm2128_vm5, %v2127_v62, %v2107_v53  ;;  %v2119_v6 = vpop.permute.xlu0 %2118 }
0x10eb   :  { %v2131_v10 = vsel %vm2130_vm6, %v2129_v63, %v2110_v55 }
0x10ec   :  { %v2133_v11 = vsel %vm2132_vm7, %v2131_v10, %v2113_v57 }
0x10ed   :  { %v2135_v13 = vsel %vm2134_vm8, %v2133_v11, %v2116_v4 }
0x10ee   :  { %v2137_v24 = vsel %vm2136_vm9, %v2135_v13, %v2119_v6  ;;  %v2122_v16 = vpop.permute.xlu0 %2121 }
0x10ef   :  { %v2139_v17 = vsel %vm2138_vm10, %v2137_v24, %v2122_v16 }
0x10f0   :  { %2140 = vst [vmem:[#allocation2] sm:$0xff] %v2139_v17 }
0x10f1   :  { %2510 = shalt.err (!%p2507_p4)
}
0x10f2   :  { %s2511_s8 = scalar_lea.hbm %s2911_s4, 128 }
0x10f3   :  { %p2512_p5 = scmp.ne.s32.totalorder %s2911_s4, %s2511_s8  ;;  %p2515_p6 = scmp.lt.u32.totalorder %s2511_s8, %s2911_s4 }
0x10f5   :  { %p2517_p7 = pnand %p2515_p6, %p2512_p5 }
0x10f7   :  { %2520 = shalt.err (!%p2517_p7)
}
0x10f8   :  { %2150 = dma.vmem_to_hbm [thread:$0]  %s2148_s29, 128, %s2911_s4, [#allocation3]  }
0x10f9   :  { %2521 = dma.done.wait [#allocation3], 128  }
0x10fa   :  { %2522 = vsyncadd [#allocation3], 4294967168 }
0x10fb   :  { %2154 = vsyncpa [#allocation3], 1 }

</bundles_post_ra>
